<compile_context>
chip_gen: v7x
topology: tpu7x:2x2x1
jax: 0.10.0
libtpu: 0.0.40
codegen_flags: <defaults>
</compile_context>

<pallas_src>
import functools

import jax
import jax.numpy as jnp
import numpy as np
from jax.experimental import pallas as pl
from jax.experimental.pallas import tpu as pltpu


# ----------------------------- Pallas kernel -------------------------------

def encoder_kernel(x_ref, wqkv_ref, wo_ref, w1_ref, w2_ref, vecs_ref, o_ref, x_scr,
                   *, nhead, n_hid, compute_dtype):
    """One (batch element, layer) grid step of the encoder.

    x_ref    : (1, S, E)        activations of this batch element (read at layer 0 only)
    wqkv_ref : (1, 3, E, E)     streamed Q/K/V weight slabs for this layer (x @ W layout)
    wo_ref   : (1, E, E)        streamed attention output projection
    w1_ref   : (1, E, H) / w2_ref: (1, H, E)   streamed feed-forward weights
    vecs_ref : (1, 16, Vp)      packed biases / LayerNorm vectors (f32, lane-padded)
    o_ref    : (1, S, E)        final output for this batch element
    x_scr    : (S, E) f32 VMEM  activation carried across the layer grid axis
    """
    S, E = x_scr.shape
    dh = E // nhead
    eps = 1e-5
    scale = 1.0 / float(dh) ** 0.5
    cdt = compute_dtype
    l = pl.program_id(1)

    def layernorm(y, g, b):
        mu = jnp.mean(y, axis=-1, keepdims=True)
        var = jnp.mean((y - mu) ** 2, axis=-1, keepdims=True)
        return (y - mu) * jax.lax.rsqrt(var + eps) * g + b

    @pl.when(l == 0)
    def _():
        x_scr[...] = x_ref[0].astype(jnp.float32)

    x = x_scr[...]                                         # (S, E) f32 carry

    vec = vecs_ref[0]                                      # (16, Vp) packed vectors
    bq, bk, bv = vec[0:1, :E], vec[1:2, :E], vec[2:3, :E]
    bo, b1, b2 = vec[3:4, :E], vec[4:5, :n_hid], vec[5:6, :E]
    g_n2, b_n2 = vec[6:7, :E], vec[7:8, :E]
    g_n1, b_n1 = vec[8:9, :E], vec[9:10, :E]

    # --- norm2 first (this variant applies norm *before* attention) ---
    x1 = layernorm(x, g_n2, b_n2)
    x1c = x1.astype(cdt)

    # --- three lane-aligned projections from the (3, E, E) weight slab ---
    q = jnp.dot(x1c, wqkv_ref[0, 0], preferred_element_type=jnp.float32) + bq
    k = jnp.dot(x1c, wqkv_ref[0, 1], preferred_element_type=jnp.float32) + bk
    v = jnp.dot(x1c, wqkv_ref[0, 2], preferred_element_type=jnp.float32) + bv
    q = q * scale                                          # PyTorch scales q incl. bias

    wo = wo_ref[0]                                         # (E, E) compute dtype
    attn = bo                                              # (1, E) f32; heads accumulate
    for h in range(nhead):
        lo = h * dh    # for E >= 128 these slices are tile-aligned; at E=32 a tiny slice
        q_h = q[:, lo:lo + dh].astype(cdt)
        k_h = k[:, lo:lo + dh].astype(cdt)
        v_h = v[:, lo:lo + dh].astype(cdt)
        # scores: contract last dims directly (no materialised K^T)
        s = jax.lax.dot_general(q_h, k_h, (((1,), (1,)), ((), ())),
                                preferred_element_type=jnp.float32)        # (S, S)
        s = s - jnp.max(s, axis=-1, keepdims=True)
        p = jnp.exp(s)
        p = p * pl.reciprocal(jnp.sum(p, axis=-1, keepdims=True), approx=True)
        ctx = jnp.dot(p.astype(cdt), v_h, preferred_element_type=jnp.float32)  # (S, dh)
        # sublane-aligned slab of the output projection -> no head concat
        attn = attn + jnp.dot(ctx.astype(cdt), wo[lo:lo + dh, :],
                              preferred_element_type=jnp.float32)

    # --- residual 1 + norm1 (residual adds to the post-norm value, per the module) ---
    x2 = x1 + attn
    x3 = layernorm(x2, g_n1, b_n1)
    x3c = x3.astype(cdt)

    # --- feed-forward ---
    h1 = jnp.maximum(
        jnp.dot(x3c, w1_ref[0], preferred_element_type=jnp.float32) + b1, 0.0)
    ff = jnp.dot(h1.astype(cdt), w2_ref[0], preferred_element_type=jnp.float32) + b2
    x4 = x3 + ff

    x_scr[...] = x4                                        # carry to next layer

    @pl.when(l == pl.num_programs(1) - 1)
    def _():
        o_ref[0] = x4.astype(o_ref.dtype)


# ------------------------------- wrapper ------------------------------------

def _pack_params(layers_params, emb_dim, n_hid, compute_dtype):
    """Stack per-layer params: 4 weight stacks (compute dtype) + 1 packed f32 vector block."""
    vpad = ((max(emb_dim, n_hid) + 127) // 128) * 128      # lane-pad packed vector rows
    nrows = 16                                             # sublane-aligned row count

    def row(vv):
        vv = jnp.asarray(vv, jnp.float32).reshape(-1)
        return jnp.pad(vv, (0, vpad - vv.shape[0]))

    wqkv, wo, w1, w2, vecs = [], [], [], [], []
    for p in layers_params:
        wqkv.append(jnp.stack([jnp.asarray(p['wq']), jnp.asarray(p['wk']),
                               jnp.asarray(p['wv'])]).astype(compute_dtype))   # (3, E, E)
        wo.append(jnp.asarray(p['wo']).astype(compute_dtype))
        w1.append(jnp.asarray(p['w1']).astype(compute_dtype))
        w2.append(jnp.asarray(p['w2']).astype(compute_dtype))
        rows = [row(p['bq']), row(p['bk']), row(p['bv']), row(p['bo']),
                row(p['b1']), row(p['b2']),
                row(p['g_n2']), row(p['b_n2']), row(p['g_n1']), row(p['b_n1'])]
        rows += [jnp.zeros((vpad,), jnp.float32)] * (nrows - len(rows))
        vecs.append(jnp.stack(rows))
    return (jnp.stack(wqkv), jnp.stack(wo), jnp.stack(w1), jnp.stack(w2),
            jnp.stack(vecs))


def transformer_encoder(emb, layers_params, nhead, compute_dtype=jnp.bfloat16):
    """emb: (S, B, E) — PyTorch seq-first convention.  Returns (S, B, E)."""
    S, B, E = emb.shape
    L = len(layers_params)
    HID = layers_params[0]['w1'].shape[1]
    wqkv, wo, w1, w2, vecs = _pack_params(layers_params, E, HID, compute_dtype)
    NV, VP = vecs.shape[1], vecs.shape[2]

    kernel = functools.partial(encoder_kernel, nhead=nhead, n_hid=HID,
                               compute_dtype=compute_dtype)

    # Explicit VMEM budget: double-buffered streamed weights for one layer + vector block
    # + activation in/out blocks + layer-carry scratch + slack.
    itemsize = np.dtype(compute_dtype).itemsize
    per_layer_w = (3 * E * E + E * E + E * HID + HID * E) * itemsize
    vec_bytes = NV * VP * 4
    act_bytes = S * E * 4
    vmem_bytes = 2 * (per_layer_w + vec_bytes + 2 * act_bytes) + act_bytes + (4 << 20)
    vmem_bytes = int(min(max(vmem_bytes, 8 << 20), 64 << 20))

    out = pl.pallas_call(
        kernel,
        out_shape=jax.ShapeDtypeStruct((B, S, E), emb.dtype),
        grid_spec=pltpu.PrefetchScalarGridSpec(
            num_scalar_prefetch=0,
            grid=(B, L),                           # (batch: parallel, layer: arbitrary)
            in_specs=[
                pl.BlockSpec((1, S, E), lambda b, l: (b, 0, 0)),          # activations
                pl.BlockSpec((1, 3, E, E), lambda b, l: (l, 0, 0, 0)),    # Wq/Wk/Wv slabs
                pl.BlockSpec((1, E, E), lambda b, l: (l, 0, 0)),          # Wo
                pl.BlockSpec((1, E, HID), lambda b, l: (l, 0, 0)),        # W1
                pl.BlockSpec((1, HID, E), lambda b, l: (l, 0, 0)),        # W2
                pl.BlockSpec((1, NV, VP), lambda b, l: (l, 0, 0)),        # bias / LN vecs
            ],
            out_specs=pl.BlockSpec((1, S, E), lambda b, l: (b, 0, 0)),
            scratch_shapes=[pltpu.VMEM((S, E), jnp.float32)],             # layer carry
        ),
        compiler_params=pltpu.CompilerParams(
            dimension_semantics=("parallel", "arbitrary"),
            vmem_limit_bytes=vmem_bytes,
        ),
    )(jnp.transpose(emb, (1, 0, 2)), wqkv, wo, w1, w2, vecs)
    return jnp.transpose(out, (1, 0, 2))


# --------------------------- parameter init ----------------------------------

def init_layer_params(key, emb_dim, n_hid):
    ks = jax.random.split(key, 6)
    s = 0.05
    f32 = jnp.float32
    return {
        # attention (stored pre-transposed: x @ W)
        'wq': jax.random.normal(ks[0], (emb_dim, emb_dim), f32) * s,
        'wk': jax.random.normal(ks[1], (emb_dim, emb_dim), f32) * s,
        'wv': jax.random.normal(ks[2], (emb_dim, emb_dim), f32) * s,
        'bq': jnp.zeros((1, emb_dim), f32),
        'bk': jnp.zeros((1, emb_dim), f32),
        'bv': jnp.zeros((1, emb_dim), f32),
        'wo': jax.random.normal(ks[3], (emb_dim, emb_dim), f32) * s,
        'bo': jnp.zeros((1, emb_dim), f32),
        # feed-forward
        'w1': jax.random.normal(ks[4], (emb_dim, n_hid), f32) * s,
        'b1': jnp.zeros((1, n_hid), f32),
        'w2': jax.random.normal(ks[5], (n_hid, emb_dim), f32) * s,
        'b2': jnp.zeros((1, emb_dim), f32),
        # layer norms (PyTorch default init: gamma=1, beta=0)
        'g_n2': jnp.ones((1, emb_dim), f32),
        'b_n2': jnp.zeros((1, emb_dim), f32),
        'g_n1': jnp.ones((1, emb_dim), f32),
        'b_n1': jnp.zeros((1, emb_dim), f32),
    }


# --------------------------- pure-JAX reference -------------------------------

def _layer_ref(x, p, nhead):
    hi = jax.lax.Precision.HIGHEST
    eps = 1e-5

    def ln(y, g, b):
        mu = y.mean(-1, keepdims=True)
        var = ((y - mu) ** 2).mean(-1, keepdims=True)
        return (y - mu) / jnp.sqrt(var + eps) * g + b

    B, S, E = x.shape
    dh = E // nhead
    x1 = ln(x, p['g_n2'], p['b_n2'])
    q = jnp.einsum('bse,ef->bsf', x1, p['wq'], precision=hi) + p['bq']
    k = jnp.einsum('bse,ef->bsf', x1, p['wk'], precision=hi) + p['bk']
    v = jnp.einsum('bse,ef->bsf', x1, p['wv'], precision=hi) + p['bv']
    q = q.reshape(B, S, nhead, dh) / jnp.sqrt(dh)
    k = k.reshape(B, S, nhead, dh)
    v = v.reshape(B, S, nhead, dh)
    s = jnp.einsum('bqhd,bkhd->bhqk', q, k, precision=hi)
    pmat = jax.nn.softmax(s, axis=-1)
    o = jnp.einsum('bhqk,bkhd->bqhd', pmat, v, precision=hi).reshape(B, S, E)
    attn = jnp.einsum('bse,ef->bsf', o, p['wo'], precision=hi) + p['bo']
    x2 = x1 + attn
    x3 = ln(x2, p['g_n1'], p['b_n1'])
    h1 = jnp.maximum(jnp.einsum('bse,eh->bsh', x3, p['w1'], precision=hi) + p['b1'], 0.0)
    ff = jnp.einsum('bsh,he->bse', h1, p['w2'], precision=hi) + p['b2']
    return x3 + ff


def transformer_encoder_ref(emb, layers_params, nhead):
    x = jnp.transpose(emb, (1, 0, 2))
    for p in layers_params:
        x = _layer_ref(x, p, nhead)
    return jnp.transpose(x, (1, 0, 2))


# --------------------------------- main ---------------------------------------

if __name__ == "__main__":
    # TransformerEncoder(input_dim, emb_dim=32, n_hid=64, n_head=4, num_layers=2, dropout=0.1)
    S, B, E, H, HID, L = 8, 2, 32, 4, 64, 2

    key = jax.random.PRNGKey(0)
    k_emb, k_p = jax.random.split(key)
    emb = jax.random.normal(k_emb, (S, B, E), jnp.float32)     # (seq, batch, emb)
    params = [init_layer_params(k, E, HID) for k in jax.random.split(k_p, L)]

    ref = jax.block_until_ready(transformer_encoder_ref(emb, params, H))

    # f32 matmul path: strict numerical parity with the PyTorch-style reference.
    enc_f32 = jax.jit(functools.partial(transformer_encoder, nhead=H,
                                        compute_dtype=jnp.float32))
    out_f32 = jax.block_until_ready(enc_f32(emb, params))
    assert out_f32.shape == (S, B, E)
    np.testing.assert_allclose(np.asarray(out_f32), np.asarray(ref), atol=1e-2, rtol=1e-2)

    # bf16 matmul path (MXU-native on v6e/v7x, halves streamed weight bytes);
    # LayerNorm / softmax / residuals stay f32, so only matmul rounding differs.
    enc_bf16 = jax.jit(functools.partial(transformer_encoder, nhead=H,
                                         compute_dtype=jnp.bfloat16))
    out_bf16 = jax.block_until_ready(enc_bf16(emb, params))
    np.testing.assert_allclose(np.asarray(out_bf16), np.asarray(ref), atol=1e-1, rtol=1e-1)

    print("KERNEL_OK")
</pallas_src>

<mosaic_0001>
module attributes {stable_mosaic.version = 11 : i64} {
  func.func @encoder_kernel(%arg0: i32, %arg1: i32, %arg2: memref<1x8x32xf32, #tpu.memory_space<vmem>>, %arg3: memref<1x3x32x32xf32, #tpu.memory_space<vmem>>, %arg4: memref<1x32x32xf32, #tpu.memory_space<vmem>>, %arg5: memref<1x32x64xf32, #tpu.memory_space<vmem>>, %arg6: memref<1x64x32xf32, #tpu.memory_space<vmem>>, %arg7: memref<1x16x128xf32, #tpu.memory_space<vmem>>, %arg8: memref<1x8x32xf32, #tpu.memory_space<vmem>>, %arg9: memref<8x32xf32, #tpu.memory_space<vmem>>) attributes {dimension_semantics = [#tpu.dimension_semantics<parallel>, #tpu.dimension_semantics<arbitrary>], iteration_bounds = array<i64: 2, 2>, scalar_prefetch = 0 : i64, scratch_operands = 1 : i64, tpu.core_type = #tpu.core_type<tc>, window_params = [{transform_indices = @transform_0, window_bounds = array<i64: 1, 8, 32>}, {transform_indices = @transform_1, window_bounds = array<i64: 1, 3, 32, 32>}, {transform_indices = @transform_2, window_bounds = array<i64: 1, 32, 32>}, {transform_indices = @transform_3, window_bounds = array<i64: 1, 32, 64>}, {transform_indices = @transform_4, window_bounds = array<i64: 1, 64, 32>}, {transform_indices = @transform_5, window_bounds = array<i64: 1, 16, 128>}, {transform_indices = @transform_6, window_bounds = array<i64: 1, 8, 32>}]} {
    %c0_i32 = arith.constant 0 : i32
    %0 = arith.cmpi eq, %arg1, %c0_i32 : i32
    %1 = arith.extui %0 : i1 to i32
    %c0_i32_0 = arith.constant 0 : i32
    %2 = arith.cmpi ne, %1, %c0_i32_0 : i32
    scf.if %2 {
      %c0_63 = arith.constant 0 : index
      %c0_64 = arith.constant 0 : index
      %c0_65 = arith.constant 0 : index
      %170 = vector.load %arg2[%c0_63, %c0_64, %c0_65] : memref<1x8x32xf32, #tpu.memory_space<vmem>>, vector<1x8x32xf32>
      %171 = vector.shape_cast %170 : vector<1x8x32xf32> to vector<8x32xf32>
      %c0_66 = arith.constant 0 : index
      %c0_67 = arith.constant 0 : index
      %172 = vector.load %arg9[%c0_66, %c0_67] : memref<8x32xf32, #tpu.memory_space<vmem>>, vector<8x32xf32>
      tpu.vector_store %arg9[%c0_66, %c0_67], %171 {strides = array<i32>} : memref<8x32xf32, #tpu.memory_space<vmem>>, vector<8x32xf32>,
    } else {
    }
    %c0 = arith.constant 0 : index
    %c0_1 = arith.constant 0 : index
    %3 = vector.load %arg9[%c0, %c0_1] : memref<8x32xf32, #tpu.memory_space<vmem>>, vector<8x32xf32>
    %c0_2 = arith.constant 0 : index
    %c0_3 = arith.constant 0 : index
    %c0_4 = arith.constant 0 : index
    %4 = vector.load %arg7[%c0_2, %c0_3, %c0_4] : memref<1x16x128xf32, #tpu.memory_space<vmem>>, vector<1x16x128xf32>
    %5 = vector.shape_cast %4 : vector<1x16x128xf32> to vector<16x128xf32>
    %6 = vector.extract_strided_slice %5 {offsets = [0, 0], sizes = [1, 32], strides = [1, 1]} : vector<16x128xf32> to vector<1x32xf32>
    %7 = vector.extract_strided_slice %5 {offsets = [1, 0], sizes = [1, 32], strides = [1, 1]} : vector<16x128xf32> to vector<1x32xf32>
    %8 = vector.extract_strided_slice %5 {offsets = [2, 0], sizes = [1, 32], strides = [1, 1]} : vector<16x128xf32> to vector<1x32xf32>
    %9 = vector.extract_strided_slice %5 {offsets = [3, 0], sizes = [1, 32], strides = [1, 1]} : vector<16x128xf32> to vector<1x32xf32>
    %10 = vector.extract_strided_slice %5 {offsets = [4, 0], sizes = [1, 64], strides = [1, 1]} : vector<16x128xf32> to vector<1x64xf32>
    %11 = vector.extract_strided_slice %5 {offsets = [5, 0], sizes = [1, 32], strides = [1, 1]} : vector<16x128xf32> to vector<1x32xf32>
    %12 = vector.extract_strided_slice %5 {offsets = [6, 0], sizes = [1, 32], strides = [1, 1]} : vector<16x128xf32> to vector<1x32xf32>
    %13 = vector.extract_strided_slice %5 {offsets = [7, 0], sizes = [1, 32], strides = [1, 1]} : vector<16x128xf32> to vector<1x32xf32>
    %14 = vector.extract_strided_slice %5 {offsets = [8, 0], sizes = [1, 32], strides = [1, 1]} : vector<16x128xf32> to vector<1x32xf32>
    %15 = vector.extract_strided_slice %5 {offsets = [9, 0], sizes = [1, 32], strides = [1, 1]} : vector<16x128xf32> to vector<1x32xf32>
    %cst = arith.constant dense<0.000000e+00> : vector<8xf32>
    %16 = vector.multi_reduction <add>, %3, %cst [1] : vector<8x32xf32> to vector<8xf32>
    %17 = vector.shape_cast %16 : vector<8xf32> to vector<8x1xf32>
    %cst_5 = arith.constant 3.200000e+01 : f32
    %18 = vector.broadcast %cst_5 : f32 to vector<8x1xf32>
    %19 = arith.divf %17, %18 : vector<8x1xf32>
    %20 = vector.broadcast %19 : vector<8x1xf32> to vector<8x32xf32>
    %21 = arith.subf %3, %20 : vector<8x32xf32>
    %22 = arith.mulf %21, %21 : vector<8x32xf32>
    %cst_6 = arith.constant dense<0.000000e+00> : vector<8xf32>
    %23 = vector.multi_reduction <add>, %22, %cst_6 [1] : vector<8x32xf32> to vector<8xf32>
    %24 = vector.shape_cast %23 : vector<8xf32> to vector<8x1xf32>
    %cst_7 = arith.constant 3.200000e+01 : f32
    %25 = vector.broadcast %cst_7 : f32 to vector<8x1xf32>
    %26 = arith.divf %24, %25 : vector<8x1xf32>
    %27 = vector.broadcast %19 : vector<8x1xf32> to vector<8x32xf32>
    %28 = arith.subf %3, %27 : vector<8x32xf32>
    %cst_8 = arith.constant 9.99999974E-6 : f32
    %29 = vector.broadcast %cst_8 : f32 to vector<8x1xf32>
    %30 = arith.addf %26, %29 : vector<8x1xf32>
    %31 = math.rsqrt %30 : vector<8x1xf32>
    %32 = vector.broadcast %31 : vector<8x1xf32> to vector<8x32xf32>
    %33 = arith.mulf %28, %32 : vector<8x32xf32>
    %34 = vector.broadcast %12 : vector<1x32xf32> to vector<8x32xf32>
    %35 = arith.mulf %33, %34 : vector<8x32xf32>
    %36 = vector.broadcast %13 : vector<1x32xf32> to vector<8x32xf32>
    %37 = arith.addf %35, %36 : vector<8x32xf32>
    %c0_9 = arith.constant 0 : index
    %c0_10 = arith.constant 0 : index
    %c0_11 = arith.constant 0 : index
    %c0_12 = arith.constant 0 : index
    %38 = vector.load %arg3[%c0_9, %c0_10, %c0_11, %c0_12] : memref<1x3x32x32xf32, #tpu.memory_space<vmem>>, vector<1x1x32x32xf32>
    %39 = vector.shape_cast %38 : vector<1x1x32x32xf32> to vector<32x32xf32>
    %cst_13 = arith.constant dense<0.000000e+00> : vector<8x32xf32>
    %40 = tpu.matmul %37, %39, %cst_13 {dimension_numbers = #tpu.dot_dimension_numbers<[1], [0], [0], [1], [0, 0, 1, 1], [], []>} : vector<8x32xf32>, vector<32x32xf32>, vector<8x32xf32> -> vector<8x32xf32>
    %41 = vector.broadcast %6 : vector<1x32xf32> to vector<8x32xf32>
    %42 = arith.addf %40, %41 : vector<8x32xf32>
    %c0_14 = arith.constant 0 : index
    %c1 = arith.constant 1 : index
    %c0_15 = arith.constant 0 : index
    %c0_16 = arith.constant 0 : index
    %43 = vector.load %arg3[%c0_14, %c1, %c0_15, %c0_16] : memref<1x3x32x32xf32, #tpu.memory_space<vmem>>, vector<1x1x32x32xf32>
    %44 = vector.shape_cast %43 : vector<1x1x32x32xf32> to vector<32x32xf32>
    %cst_17 = arith.constant dense<0.000000e+00> : vector<8x32xf32>
    %45 = tpu.matmul %37, %44, %cst_17 {dimension_numbers = #tpu.dot_dimension_numbers<[1], [0], [0], [1], [0, 0, 1, 1], [], []>} : vector<8x32xf32>, vector<32x32xf32>, vector<8x32xf32> -> vector<8x32xf32>
    %46 = vector.broadcast %7 : vector<1x32xf32> to vector<8x32xf32>
    %47 = arith.addf %45, %46 : vector<8x32xf32>
    %c0_18 = arith.constant 0 : index
    %c2 = arith.constant 2 : index
    %c0_19 = arith.constant 0 : index
    %c0_20 = arith.constant 0 : index
    %48 = vector.load %arg3[%c0_18, %c2, %c0_19, %c0_20] : memref<1x3x32x32xf32, #tpu.memory_space<vmem>>, vector<1x1x32x32xf32>
    %49 = vector.shape_cast %48 : vector<1x1x32x32xf32> to vector<32x32xf32>
    %cst_21 = arith.constant dense<0.000000e+00> : vector<8x32xf32>
    %50 = tpu.matmul %37, %49, %cst_21 {dimension_numbers = #tpu.dot_dimension_numbers<[1], [0], [0], [1], [0, 0, 1, 1], [], []>} : vector<8x32xf32>, vector<32x32xf32>, vector<8x32xf32> -> vector<8x32xf32>
    %51 = vector.broadcast %8 : vector<1x32xf32> to vector<8x32xf32>
    %52 = arith.addf %50, %51 : vector<8x32xf32>
    %cst_22 = arith.constant 0.353553385 : f32
    %53 = vector.broadcast %cst_22 : f32 to vector<8x32xf32>
    %54 = arith.mulf %42, %53 : vector<8x32xf32>
    %c0_23 = arith.constant 0 : index
    %c0_24 = arith.constant 0 : index
    %c0_25 = arith.constant 0 : index
    %55 = vector.load %arg4[%c0_23, %c0_24, %c0_25] : memref<1x32x32xf32, #tpu.memory_space<vmem>>, vector<1x32x32xf32>
    %56 = vector.shape_cast %55 : vector<1x32x32xf32> to vector<32x32xf32>
    %57 = vector.extract_strided_slice %54 {offsets = [0, 0], sizes = [8, 8], strides = [1, 1]} : vector<8x32xf32> to vector<8x8xf32>
    %58 = vector.extract_strided_slice %47 {offsets = [0, 0], sizes = [8, 8], strides = [1, 1]} : vector<8x32xf32> to vector<8x8xf32>
    %59 = vector.extract_strided_slice %52 {offsets = [0, 0], sizes = [8, 8], strides = [1, 1]} : vector<8x32xf32> to vector<8x8xf32>
    %cst_26 = arith.constant dense<0.000000e+00> : vector<8x8xf32>
    %60 = tpu.matmul %57, %58, %cst_26 {dimension_numbers = #tpu.dot_dimension_numbers<[1], [1], [0], [0], [0, 0, 1, 0], [], []>} : vector<8x8xf32>, vector<8x8xf32>, vector<8x8xf32> -> vector<8x8xf32>
    %cst_27 = arith.constant dense<0xFF800000> : vector<8xf32>
    %61 = vector.multi_reduction <maximumf>, %60, %cst_27 [1] : vector<8x8xf32> to vector<8xf32>
    %62 = vector.shape_cast %61 : vector<8xf32> to vector<8x1xf32>
    %63 = vector.broadcast %62 : vector<8x1xf32> to vector<8x8xf32>
    %64 = arith.subf %60, %63 : vector<8x8xf32>
    %65 = math.exp %64 : vector<8x8xf32>
    %cst_28 = arith.constant dense<0.000000e+00> : vector<8xf32>
    %66 = vector.multi_reduction <add>, %65, %cst_28 [1] : vector<8x8xf32> to vector<8xf32>
    %67 = vector.shape_cast %66 : vector<8xf32> to vector<8x1xf32>
    %68 = tpu.reciprocal %67 {approx = true} : vector<8x1xf32> -> vector<8x1xf32>
    %69 = vector.broadcast %68 : vector<8x1xf32> to vector<8x8xf32>
    %70 = arith.mulf %65, %69 : vector<8x8xf32>
    %cst_29 = arith.constant dense<0.000000e+00> : vector<8x8xf32>
    %71 = tpu.matmul %70, %59, %cst_29 {dimension_numbers = #tpu.dot_dimension_numbers<[1], [0], [0], [1], [0, 0, 1, 1], [], []>} : vector<8x8xf32>, vector<8x8xf32>, vector<8x8xf32> -> vector<8x8xf32>
    %72 = vector.extract_strided_slice %56 {offsets = [0, 0], sizes = [8, 32], strides = [1, 1]} : vector<32x32xf32> to vector<8x32xf32>
    %cst_30 = arith.constant dense<0.000000e+00> : vector<8x32xf32>
    %73 = tpu.matmul %71, %72, %cst_30 {dimension_numbers = #tpu.dot_dimension_numbers<[1], [0], [0], [1], [0, 0, 1, 1], [], []>} : vector<8x8xf32>, vector<8x32xf32>, vector<8x32xf32> -> vector<8x32xf32>
    %74 = vector.broadcast %9 : vector<1x32xf32> to vector<8x32xf32>
    %75 = arith.addf %74, %73 : vector<8x32xf32>
    %76 = vector.extract_strided_slice %54 {offsets = [0, 8], sizes = [8, 8], strides = [1, 1]} : vector<8x32xf32> to vector<8x8xf32>
    %77 = vector.extract_strided_slice %47 {offsets = [0, 8], sizes = [8, 8], strides = [1, 1]} : vector<8x32xf32> to vector<8x8xf32>
    %78 = vector.extract_strided_slice %52 {offsets = [0, 8], sizes = [8, 8], strides = [1, 1]} : vector<8x32xf32> to vector<8x8xf32>
    %cst_31 = arith.constant dense<0.000000e+00> : vector<8x8xf32>
    %79 = tpu.matmul %76, %77, %cst_31 {dimension_numbers = #tpu.dot_dimension_numbers<[1], [1], [0], [0], [0, 0, 1, 0], [], []>} : vector<8x8xf32>, vector<8x8xf32>, vector<8x8xf32> -> vector<8x8xf32>
    %cst_32 = arith.constant dense<0xFF800000> : vector<8xf32>
    %80 = vector.multi_reduction <maximumf>, %79, %cst_32 [1] : vector<8x8xf32> to vector<8xf32>
    %81 = vector.shape_cast %80 : vector<8xf32> to vector<8x1xf32>
    %82 = vector.broadcast %81 : vector<8x1xf32> to vector<8x8xf32>
    %83 = arith.subf %79, %82 : vector<8x8xf32>
    %84 = math.exp %83 : vector<8x8xf32>
    %cst_33 = arith.constant dense<0.000000e+00> : vector<8xf32>
    %85 = vector.multi_reduction <add>, %84, %cst_33 [1] : vector<8x8xf32> to vector<8xf32>
    %86 = vector.shape_cast %85 : vector<8xf32> to vector<8x1xf32>
    %87 = tpu.reciprocal %86 {approx = true} : vector<8x1xf32> -> vector<8x1xf32>
    %88 = vector.broadcast %87 : vector<8x1xf32> to vector<8x8xf32>
    %89 = arith.mulf %84, %88 : vector<8x8xf32>
    %cst_34 = arith.constant dense<0.000000e+00> : vector<8x8xf32>
    %90 = tpu.matmul %89, %78, %cst_34 {dimension_numbers = #tpu.dot_dimension_numbers<[1], [0], [0], [1], [0, 0, 1, 1], [], []>} : vector<8x8xf32>, vector<8x8xf32>, vector<8x8xf32> -> vector<8x8xf32>
    %91 = vector.extract_strided_slice %56 {offsets = [8, 0], sizes = [8, 32], strides = [1, 1]} : vector<32x32xf32> to vector<8x32xf32>
    %cst_35 = arith.constant dense<0.000000e+00> : vector<8x32xf32>
    %92 = tpu.matmul %90, %91, %cst_35 {dimension_numbers = #tpu.dot_dimension_numbers<[1], [0], [0], [1], [0, 0, 1, 1], [], []>} : vector<8x8xf32>, vector<8x32xf32>, vector<8x32xf32> -> vector<8x32xf32>
    %93 = arith.addf %75, %92 : vector<8x32xf32>
    %94 = vector.extract_strided_slice %54 {offsets = [0, 16], sizes = [8, 8], strides = [1, 1]} : vector<8x32xf32> to vector<8x8xf32>
    %95 = vector.extract_strided_slice %47 {offsets = [0, 16], sizes = [8, 8], strides = [1, 1]} : vector<8x32xf32> to vector<8x8xf32>
    %96 = vector.extract_strided_slice %52 {offsets = [0, 16], sizes = [8, 8], strides = [1, 1]} : vector<8x32xf32> to vector<8x8xf32>
    %cst_36 = arith.constant dense<0.000000e+00> : vector<8x8xf32>
    %97 = tpu.matmul %94, %95, %cst_36 {dimension_numbers = #tpu.dot_dimension_numbers<[1], [1], [0], [0], [0, 0, 1, 0], [], []>} : vector<8x8xf32>, vector<8x8xf32>, vector<8x8xf32> -> vector<8x8xf32>
    %cst_37 = arith.constant dense<0xFF800000> : vector<8xf32>
    %98 = vector.multi_reduction <maximumf>, %97, %cst_37 [1] : vector<8x8xf32> to vector<8xf32>
    %99 = vector.shape_cast %98 : vector<8xf32> to vector<8x1xf32>
    %100 = vector.broadcast %99 : vector<8x1xf32> to vector<8x8xf32>
    %101 = arith.subf %97, %100 : vector<8x8xf32>
    %102 = math.exp %101 : vector<8x8xf32>
    %cst_38 = arith.constant dense<0.000000e+00> : vector<8xf32>
    %103 = vector.multi_reduction <add>, %102, %cst_38 [1] : vector<8x8xf32> to vector<8xf32>
    %104 = vector.shape_cast %103 : vector<8xf32> to vector<8x1xf32>
    %105 = tpu.reciprocal %104 {approx = true} : vector<8x1xf32> -> vector<8x1xf32>
    %106 = vector.broadcast %105 : vector<8x1xf32> to vector<8x8xf32>
    %107 = arith.mulf %102, %106 : vector<8x8xf32>
    %cst_39 = arith.constant dense<0.000000e+00> : vector<8x8xf32>
    %108 = tpu.matmul %107, %96, %cst_39 {dimension_numbers = #tpu.dot_dimension_numbers<[1], [0], [0], [1], [0, 0, 1, 1], [], []>} : vector<8x8xf32>, vector<8x8xf32>, vector<8x8xf32> -> vector<8x8xf32>
    %109 = vector.extract_strided_slice %56 {offsets = [16, 0], sizes = [8, 32], strides = [1, 1]} : vector<32x32xf32> to vector<8x32xf32>
    %cst_40 = arith.constant dense<0.000000e+00> : vector<8x32xf32>
    %110 = tpu.matmul %108, %109, %cst_40 {dimension_numbers = #tpu.dot_dimension_numbers<[1], [0], [0], [1], [0, 0, 1, 1], [], []>} : vector<8x8xf32>, vector<8x32xf32>, vector<8x32xf32> -> vector<8x32xf32>
    %111 = arith.addf %93, %110 : vector<8x32xf32>
    %112 = vector.extract_strided_slice %54 {offsets = [0, 24], sizes = [8, 8], strides = [1, 1]} : vector<8x32xf32> to vector<8x8xf32>
    %113 = vector.extract_strided_slice %47 {offsets = [0, 24], sizes = [8, 8], strides = [1, 1]} : vector<8x32xf32> to vector<8x8xf32>
    %114 = vector.extract_strided_slice %52 {offsets = [0, 24], sizes = [8, 8], strides = [1, 1]} : vector<8x32xf32> to vector<8x8xf32>
    %cst_41 = arith.constant dense<0.000000e+00> : vector<8x8xf32>
    %115 = tpu.matmul %112, %113, %cst_41 {dimension_numbers = #tpu.dot_dimension_numbers<[1], [1], [0], [0], [0, 0, 1, 0], [], []>} : vector<8x8xf32>, vector<8x8xf32>, vector<8x8xf32> -> vector<8x8xf32>
    %cst_42 = arith.constant dense<0xFF800000> : vector<8xf32>
    %116 = vector.multi_reduction <maximumf>, %115, %cst_42 [1] : vector<8x8xf32> to vector<8xf32>
    %117 = vector.shape_cast %116 : vector<8xf32> to vector<8x1xf32>
    %118 = vector.broadcast %117 : vector<8x1xf32> to vector<8x8xf32>
    %119 = arith.subf %115, %118 : vector<8x8xf32>
    %120 = math.exp %119 : vector<8x8xf32>
    %cst_43 = arith.constant dense<0.000000e+00> : vector<8xf32>
    %121 = vector.multi_reduction <add>, %120, %cst_43 [1] : vector<8x8xf32> to vector<8xf32>
    %122 = vector.shape_cast %121 : vector<8xf32> to vector<8x1xf32>
    %123 = tpu.reciprocal %122 {approx = true} : vector<8x1xf32> -> vector<8x1xf32>
    %124 = vector.broadcast %123 : vector<8x1xf32> to vector<8x8xf32>
    %125 = arith.mulf %120, %124 : vector<8x8xf32>
    %cst_44 = arith.constant dense<0.000000e+00> : vector<8x8xf32>
    %126 = tpu.matmul %125, %114, %cst_44 {dimension_numbers = #tpu.dot_dimension_numbers<[1], [0], [0], [1], [0, 0, 1, 1], [], []>} : vector<8x8xf32>, vector<8x8xf32>, vector<8x8xf32> -> vector<8x8xf32>
    %127 = vector.extract_strided_slice %56 {offsets = [24, 0], sizes = [8, 32], strides = [1, 1]} : vector<32x32xf32> to vector<8x32xf32>
    %cst_45 = arith.constant dense<0.000000e+00> : vector<8x32xf32>
    %128 = tpu.matmul %126, %127, %cst_45 {dimension_numbers = #tpu.dot_dimension_numbers<[1], [0], [0], [1], [0, 0, 1, 1], [], []>} : vector<8x8xf32>, vector<8x32xf32>, vector<8x32xf32> -> vector<8x32xf32>
    %129 = arith.addf %111, %128 : vector<8x32xf32>
    %130 = arith.addf %37, %129 : vector<8x32xf32>
    %cst_46 = arith.constant dense<0.000000e+00> : vector<8xf32>
    %131 = vector.multi_reduction <add>, %130, %cst_46 [1] : vector<8x32xf32> to vector<8xf32>
    %132 = vector.shape_cast %131 : vector<8xf32> to vector<8x1xf32>
    %cst_47 = arith.constant 3.200000e+01 : f32
    %133 = vector.broadcast %cst_47 : f32 to vector<8x1xf32>
    %134 = arith.divf %132, %133 : vector<8x1xf32>
    %135 = vector.broadcast %134 : vector<8x1xf32> to vector<8x32xf32>
    %136 = arith.subf %130, %135 : vector<8x32xf32>
    %137 = arith.mulf %136, %136 : vector<8x32xf32>
    %cst_48 = arith.constant dense<0.000000e+00> : vector<8xf32>
    %138 = vector.multi_reduction <add>, %137, %cst_48 [1] : vector<8x32xf32> to vector<8xf32>
    %139 = vector.shape_cast %138 : vector<8xf32> to vector<8x1xf32>
    %cst_49 = arith.constant 3.200000e+01 : f32
    %140 = vector.broadcast %cst_49 : f32 to vector<8x1xf32>
    %141 = arith.divf %139, %140 : vector<8x1xf32>
    %142 = vector.broadcast %134 : vector<8x1xf32> to vector<8x32xf32>
    %143 = arith.subf %130, %142 : vector<8x32xf32>
    %cst_50 = arith.constant 9.99999974E-6 : f32
    %144 = vector.broadcast %cst_50 : f32 to vector<8x1xf32>
    %145 = arith.addf %141, %144 : vector<8x1xf32>
    %146 = math.rsqrt %145 : vector<8x1xf32>
    %147 = vector.broadcast %146 : vector<8x1xf32> to vector<8x32xf32>
    %148 = arith.mulf %143, %147 : vector<8x32xf32>
    %149 = vector.broadcast %14 : vector<1x32xf32> to vector<8x32xf32>
    %150 = arith.mulf %148, %149 : vector<8x32xf32>
    %151 = vector.broadcast %15 : vector<1x32xf32> to vector<8x32xf32>
    %152 = arith.addf %150, %151 : vector<8x32xf32>
    %c0_51 = arith.constant 0 : index
    %c0_52 = arith.constant 0 : index
    %c0_53 = arith.constant 0 : index
    %153 = vector.load %arg5[%c0_51, %c0_52, %c0_53] : memref<1x32x64xf32, #tpu.memory_space<vmem>>, vector<1x32x64xf32>
    %154 = vector.shape_cast %153 : vector<1x32x64xf32> to vector<32x64xf32>
    %cst_54 = arith.constant dense<0.000000e+00> : vector<8x64xf32>
    %155 = tpu.matmul %152, %154, %cst_54 {dimension_numbers = #tpu.dot_dimension_numbers<[1], [0], [0], [1], [0, 0, 1, 1], [], []>} : vector<8x32xf32>, vector<32x64xf32>, vector<8x64xf32> -> vector<8x64xf32>
    %156 = vector.broadcast %10 : vector<1x64xf32> to vector<8x64xf32>
    %157 = arith.addf %155, %156 : vector<8x64xf32>
    %cst_55 = arith.constant 0.000000e+00 : f32
    %158 = vector.broadcast %cst_55 : f32 to vector<8x64xf32>
    %159 = arith.maximumf %157, %158 : vector<8x64xf32>
    %c0_56 = arith.constant 0 : index
    %c0_57 = arith.constant 0 : index
    %c0_58 = arith.constant 0 : index
    %160 = vector.load %arg6[%c0_56, %c0_57, %c0_58] : memref<1x64x32xf32, #tpu.memory_space<vmem>>, vector<1x64x32xf32>
    %161 = vector.shape_cast %160 : vector<1x64x32xf32> to vector<64x32xf32>
    %cst_59 = arith.constant dense<0.000000e+00> : vector<8x32xf32>
    %162 = tpu.matmul %159, %161, %cst_59 {dimension_numbers = #tpu.dot_dimension_numbers<[1], [0], [0], [1], [0, 0, 1, 1], [], []>} : vector<8x64xf32>, vector<64x32xf32>, vector<8x32xf32> -> vector<8x32xf32>
    %163 = vector.broadcast %11 : vector<1x32xf32> to vector<8x32xf32>
    %164 = arith.addf %162, %163 : vector<8x32xf32>
    %165 = arith.addf %152, %164 : vector<8x32xf32>
    %c0_60 = arith.constant 0 : index
    %c0_61 = arith.constant 0 : index
    %166 = vector.load %arg9[%c0_60, %c0_61] : memref<8x32xf32, #tpu.memory_space<vmem>>, vector<8x32xf32>
    tpu.vector_store %arg9[%c0_60, %c0_61], %165 {strides = array<i32>} : memref<8x32xf32, #tpu.memory_space<vmem>>, vector<8x32xf32>,
    %c1_i32 = arith.constant 1 : i32
    %167 = arith.cmpi eq, %arg1, %c1_i32 : i32
    %168 = arith.extui %167 : i1 to i32
    %c0_i32_62 = arith.constant 0 : i32
    %169 = arith.cmpi ne, %168, %c0_i32_62 : i32
    scf.if %169 {
      %c0_63 = arith.constant 0 : index
      %c0_64 = arith.constant 0 : index
      %c0_65 = arith.constant 0 : index
      %170 = vector.load %arg8[%c0_63, %c0_64, %c0_65] : memref<1x8x32xf32, #tpu.memory_space<vmem>>, vector<1x8x32xf32>
      %171 = vector.shape_cast %170 : vector<1x8x32xf32> to vector<8x32xf32>
      %172 = vector.shape_cast %165 : vector<8x32xf32> to vector<1x8x32xf32>
      tpu.vector_store %arg8[%c0_63, %c0_64, %c0_65], %172 {strides = array<i32>} : memref<1x8x32xf32, #tpu.memory_space<vmem>>, vector<1x8x32xf32>,
    } else {
    }
    return
  }
  func.func @transform_0(%arg0: i32, %arg1: i32) -> (i32, i32, i32) {
    %c0_i32 = arith.constant 0 : i32
    %c0_i32_0 = arith.constant 0 : i32
    %c0_i32_1 = arith.constant 0 : i32
    return %arg0, %c0_i32, %c0_i32_0 : i32, i32, i32
  }
  func.func @transform_1(%arg0: i32, %arg1: i32) -> (i32, i32, i32, i32) {
    %c0_i32 = arith.constant 0 : i32
    %c0_i32_0 = arith.constant 0 : i32
    %c0_i32_1 = arith.constant 0 : i32
    %c0_i32_2 = arith.constant 0 : i32
    return %arg1, %c0_i32, %c0_i32_0, %c0_i32_1 : i32, i32, i32, i32
  }
  func.func @transform_2(%arg0: i32, %arg1: i32) -> (i32, i32, i32) {
    %c0_i32 = arith.constant 0 : i32
    %c0_i32_0 = arith.constant 0 : i32
    %c0_i32_1 = arith.constant 0 : i32
    return %arg1, %c0_i32, %c0_i32_0 : i32, i32, i32
  }
  func.func @transform_3(%arg0: i32, %arg1: i32) -> (i32, i32, i32) {
    %c0_i32 = arith.constant 0 : i32
    %c0_i32_0 = arith.constant 0 : i32
    %c0_i32_1 = arith.constant 0 : i32
    return %arg1, %c0_i32, %c0_i32_0 : i32, i32, i32
  }
  func.func @transform_4(%arg0: i32, %arg1: i32) -> (i32, i32, i32) {
    %c0_i32 = arith.constant 0 : i32
    %c0_i32_0 = arith.constant 0 : i32
    %c0_i32_1 = arith.constant 0 : i32
    return %arg1, %c0_i32, %c0_i32_0 : i32, i32, i32
  }
  func.func @transform_5(%arg0: i32, %arg1: i32) -> (i32, i32, i32) {
    %c0_i32 = arith.constant 0 : i32
    %c0_i32_0 = arith.constant 0 : i32
    %c0_i32_1 = arith.constant 0 : i32
    return %arg1, %c0_i32, %c0_i32_0 : i32, i32, i32
  }
  func.func @transform_6(%arg0: i32, %arg1: i32) -> (i32, i32, i32) {
    %c0_i32 = arith.constant 0 : i32
    %c0_i32_0 = arith.constant 0 : i32
    %c0_i32_1 = arith.constant 0 : i32
    return %arg0, %c0_i32, %c0_i32_0 : i32, i32, i32
  }
}

</mosaic_0001>

<bundles_post_ra>
// kernel: transformer_encoder.1
= control target key start
LH: loop header
LB: loop body
LE: loop exit
PB: predicated region body
PF: predicated region fallthrough
CT: control target
= control target key end

     0   :  { %s2331_s21 = smov 0   ;;  %s2333_s22 = smov 0   ;;  %s2599_s0 = inlined_call_operand.vmem [shape: f32[2,8,32], index: 0, kind: input, shape index: {}]   ;;  %s2600_s1 = inlined_call_operand.vmem [shape: f32[2,3,32,32], index: 1, kind: input, shape index: {}]   ;;  %s2601_s2 = inlined_call_operand.vmem [shape: f32[2,32,32], index: 2, kind: input, shape index: {}]   ;;  %s2602_s3 = inlined_call_operand.vmem [shape: f32[2,32,64], index: 3, kind: input, shape index: {}]   ;;  %s2603_s4 = inlined_call_operand.vmem [shape: f32[2,64,32], index: 4, kind: input, shape index: {}]   ;;  %s2604_s5 = inlined_call_operand.vmem [shape: f32[2,16,128], index: 5, kind: input, shape index: {}]   ;;  %s2605_s6 = inlined_call_operand.vmem [shape: f32[2,8,32], index: 6, kind: output, shape index: {}]  }
   0x1   :  { %2606 = sst [smem:[#allocation4_spill]] %s2599_s0  ;;  %s2335_s23 = smov 0  }
   0x2   :  { %s2337_s24 = smov 0   ;;  %s2339_s25 = smov 0  }
   0x3 LB: > { %s25_s26 = sadd.s32 1, %s2280_s23  ;;  %s28_s27 = sadd.s32 1, %s2284_s24  ;;  %s2288_s25 = sphi %s2339_s25, %s16_s25   ;;  %s2284_s24 = sphi %s2337_s24, %s2613_s24   ;;  %s2280_s23 = sphi %s2335_s23, %s2612_s23   ;;  %s2276_s22 = sphi %s2333_s22, %s2611_s22   ;;  %s2272_s21 = sphi %s2331_s21, %s2610_s21  }
   0x4   : > { %p26_p0 = scmp.ge.s32.totalorder %s25_s26, 2  ;;  %p1922_p1 = scmp.ge.s32.totalorder %s2288_s25, 1 }
   0x5   : > { %p273_p2 = scmp.lt.s32.totalorder %s2288_s25, 5 }
   0x6   : > { %s2615_s26 = smov (%p26_p0, %s25_s26), 0  ;;  %s2617_s27 = smov (!%p26_p0, %s28_s27), %s2284_s24 }
   0x7   : > { %p274_p3 = pnand %p1922_p1, %p273_p2  ;;  %p30_p4 = scmp.ge.s32.totalorder %s2617_s27, 2 }
   0x8   : > { %p326_p5 = scmp.lt.s32.totalorder (!%p274_p3), %s2276_s22, 1  ;;  %p330_p6 = scmp.lt.s32.totalorder (!%p274_p3), %s2272_s21, 1 }
   0x9   : > { %s2619_s27 = smov (%p30_p4, %s2617_s27), 0  ;;  %277 = sbr.rel (%p274_p3) target bundleno = 3849 (0xf09), region = 44 }
   0xa   : > { %2607 = sst [smem:[#allocation3_spill]] %s2619_s27  ;;  %s2608_s0 = sld [smem:[#allocation4_spill]] (!%p274_p3) }
   0xb   : > { %p1934_p7 = scmp.ne.s32.totalorder (!%p274_p3), %s2272_s21, 0 }
  0x10   : > { %s2621_s22 = smov (!%p326_p5, %s2276_s22), 1  ;;  %vm364_vm0 = vcmask (!%p1934_p7), 261120  }
  0x11   : > { %s331_s28 = scalar_select %p330_p6, %s2272_s21, 1 }
  0x12   : > { %s1923_s29 = sshll.u32 %s2621_s22, 3  ;;  %362 = sbr.rel (%p1934_p7) target bundleno = 25 (0x19), region = 48 }
  0x13   : > { %s329_s8 = scalar_lea.vmem %s2608_s0, %s1923_s29  ;;  %s2183_s9 = smul.u32 96, %s331_s28 }
  0x14   : > { %s1967_s10 = sshll.u32 %s331_s28, 5  ;;  %s1969_s11 = sshll.u32 %s331_s28, 6  ;;  %v363_v0 = vld [vmem:[%s329_s8] sm:$0xff] (!%p1934_p7) }
  0x15   : > { %s2371_s14 = scalar_lea.vmem %s2600_s1, %s2183_s9  ;;  %s2376_s17 = scalar_lea.vmem %s2601_s2, %s1967_s10  ;;  %365 = vst.msk [vmem:[#allocation2] sm:$0xff] (!%p1934_p7), %vm364_vm0, %v363_v0 }
  0x16   : > { %s2381_s20 = scalar_lea.vmem %s2602_s3, %s1967_s10  ;;  %s2386_s7 = scalar_lea.vmem %s2603_s4, %s1969_s11 }
  0x17   : > { %s1970_s0 = sshll.u32 %s331_s28, 4  ;;  %s2391_s9 = scalar_lea.vmem %s2605_s6, %s1923_s29 }
  0x18   : > { %s2396_s16 = scalar_lea.vmem %s2604_s5, %s1970_s0 }
  0x19 PF: > { %vm369_vm1 = vcmask 261120   ;;  %v394_v8 = vld [vmem:[%s2371_s14] sm:$0xff]  ;;  %v395_v9 = vld [vmem:[%s2371_s14 + $0x8] sm:$0xff]  ;;  %v2290_v11 = vmov 0.0|0.0   ;;  %v396_v14 = vld [vmem:[%s2371_s14 + $0x10] sm:$0xff]  ;;  %vm2291_vm2 = vmmov 0   ;;  %v384_v24 = vlaneseq }
  0x1a   : > { %v1936_v10 = vld [vmem:[%s2371_s14 + $0x20] sm:$0xff]  ;;  %2147 = vmatprep.subr.bf16.mxu0 %v2290_v11  ;;  %v2148_v12 = vpack.c.bf16 %v395_v9, %v394_v8  ;;  %2153 = vmatprep.subr.bf16.mxu1 %v2290_v11  ;;  %v1937_v13 = vld [vmem:[%s2371_s14 + $0x28] sm:$0xff]  ;;  %v397_v15 = vld [vmem:[%s2371_s14 + $0x18] sm:$0xff]  ;;  %v2292_v19 = vmov 0.0   ;;  %vm638_vm3 = vcmask 64512   ;;  %s2293_s0 = smov 120  }
  0x1b   : > { %v2154_v16 = vpack.c.bf16 %v1937_v13, %v1936_v10  ;;  %v1938_v17 = vld [vmem:[%s2371_s14 + $0x30] sm:$0xff]  ;;  %v1939_v18 = vld [vmem:[%s2371_s14 + $0x38] sm:$0xff]  ;;  %2032 = vmatprep.mubr.msk.f32.mxu0 %vm2291_vm2, %v2292_v19  ;;  %2043 = vmatprep.mubr.msk.f32.mxu1 %vm2291_vm2, %v2292_v19  ;;  %v2151_v20 = vpack.c.bf16 %v397_v15, %v396_v14  ;;  %v2419_v26 = vshrl.u32 %v384_v24, 7  ;;  %v2423_v28 = vld [vmem:[%s2396_s16] sm:$0xff]  ;;  %s2294_s27 = smov 112   ;;  %s2295_s28 = smov 104  }
  0x1c   : > { %v366_v1 = vld [vmem:[#allocation2] sm:$0xff]  ;;  %2149 = vmatpush3.bf16.msra.mxu0 %v2148_v12  ;;  %v2157_v21 = vpack.c.bf16 %v1939_v18, %v1938_v17  ;;  %v1942_v35 = vld [vmem:[%s2371_s14 + $0x48] sm:$0xff]  ;;  %v1943_v39 = vld [vmem:[%s2371_s14 + $0x50] sm:$0xff]  ;;  %vm1713_vm4 = vcmask 523264   ;;  %p1964_p8 = scmp.ne.s32.totalorder %s2272_s21, 1 }
  0x1d   : > { %v370_v2 = vsel %vm369_vm1, %v366_v1, 0.0  ;;  %2155 = vmatpush3.bf16.msra.mxu1 %v2154_v16  ;;  %2150 = vmatprep.subr.bf16.mxu0 %v2290_v11  ;;  %v386_v27 = vsub.s32 6, %v2419_v26  ;;  %v391_v29 = vsub.s32 7, %v2419_v26  ;;  %v1941_v34 = vld [vmem:[%s2371_s14 + $0x40] sm:$0xff]  ;;  %v1944_v40 = vld [vmem:[%s2371_s14 + $0x58] sm:$0xff]  ;;  %v400_v42 = vsub.s32 0, %v2419_v26 }
  0x1e   : > { %371 = vadd.xlane.f32.xlu0 %v370_v2  ;;  %2156 = vmatprep.subr.bf16.mxu1 %v2290_v11  ;;  %v2160_v37 = vpack.c.bf16 %v1942_v35, %v1941_v34  ;;  %v2163_v41 = vpack.c.bf16 %v1944_v40, %v1943_v39  ;;  %v482_v43 = vsub.s32 1, %v2419_v26  ;;  %v561_v52 = vsub.s32 2, %v2419_v26 }
  0x1f   : > { %v387_v30 = vrot.slane %v2423_v28, %v386_v27  ;;  %v392_v33 = vrot.slane %v2423_v28, %v391_v29  ;;  %v401_v44 = vrot.slane %v2423_v28, %v400_v42 }
  0x20   : > { %2152 = vmatpush3.bf16.msra.mxu0 %v2151_v20  ;;  %v483_v45 = vrot.slane %v2423_v28, %v482_v43  ;;  %v562_v54 = vrot.slane %v2423_v28, %v561_v52 }
  0x21   : > { %2158 = vmatpush3.bf16.msra.mxu1 %v2157_v21  ;;  %2159 = vmatprep.subr.bf16.mxu0 %v2290_v11 }
  0x22   : > { %2062 = vmatprep.subr.mxu1 %v2292_v19 }
  0xab   : > { %v372_v3 = vpop.xlane.xlu0 %371 }
  0xac   : > { %v374_v4 = vmul.f32 0.03125, %v372_v3 }
  0xae   : > { %v375_v5 = vsub.f32 %v366_v1, %v374_v4 }
  0xb0   : > { %v376_v6 = vmul.f32 %v375_v5, %v375_v5 }
  0xb2   : > { %v377_v7 = vsel %vm369_vm1, %v376_v6, 0.0 }
  0xb3   : > { %378 = vadd.xlane.f32.xlu0 %v377_v7  ;;  %v634_v7 = vld [vmem:[%s2376_s17] sm:$0xff] }
 0x140   : > { %v379_v22 = vpop.xlane.xlu0 %378 }
 0x141   : > { %v380_v23 = vmul.f32 0.03125, %v379_v22 }
 0x143   : > { %v381_v25 = vadd.f32 1e-05, %v380_v23 }
 0x145   : > { %2230 = vrsqrt.f32 %v381_v25 }
 0x14f   : > { %v2231_v31 = vpop.eup %2230 }
 0x150   : > { %v383_v32 = vmul.f32 %v2231_v31, %v375_v5 }
 0x152   : > { %v388_v36 = vmul.f32 %v387_v30, %v383_v32  ;;  %v635_v30 = vld [vmem:[%s2376_s17 + $0x8] sm:$0xff] }
 0x154   : > { %v2430_v38 = vadd.f32 %v392_v33, %v388_v36 }
 0x156   : > { %2033 = vmatmul.mubr.msk.f32.vlgmr.msra.gmra.mrb[0].mxu0 %vm369_vm1, %v2430_v38  ;;  %2044 = vmatmul.mubr.msk.f32.vlgmr.msra.gmra.mrb[0].mxu1 %vm369_vm1, %v2430_v38 }
 0x157   : > { %2161 = vmatpush3.bf16.msra.mxu0 %v2160_v37  ;;  %2054 = vmatprep.mubr.msk.f32.mxu0 %vm2291_vm2, %v2292_v19 }
 0x158   : > { %2162 = vmatprep.subr.bf16.mxu0 %v2290_v11  ;;  %2064 = vmatprep.mubr.msk.f32.mxu1 %vm2291_vm2, %v2292_v19 }
 0x15b   : > { %2164 = vmatpush3.bf16.msra.mxu0 %v2163_v41 }
 0x15c   : > { %2057 = vmatprep.subr.mxu0 %v2292_v19 }
 0x15e   : > { %2055 = vmatmul.mubr.msk.f32.vlgmr.msra.gmra.mrb[2].mxu0 %vm369_vm1, %v2430_v38 }
 0x15f   : > { %2059 = vmatprep.mubr.msk.f32.mxu0 %vm2291_vm2, %v2292_v19 }
 0x229   : > { %v471_v46 = vpop.f32.mrb[0].mxu0  ;;  %v550_v47 = vpop.f32.mrb[0].mxu1 }
 0x22a   : > { %v472_v48 = vadd.f32 %v471_v46, %v401_v44  ;;  %v2456_v49 = vadd.f32 %v550_v47, %v483_v45  ;;  %v2034_v50 = vpop.f32.mrb[1].mxu0  ;;  %v2045_v51 = vpop.f32.mrb[1].mxu1  ;;  %v874_v44 = vsub.s32 3, %v2419_v26 }
 0x22c   : > { %v2459_v53 = vmul.f32 0.35355338, %v472_v48  ;;  %879 = vrot.lane.b32.xlu0 %v2456_v49, %s2293_s0  ;;  %2058 = vmatpush3.xpose.msk.msra.mxu0 %vm638_vm3, %v2456_v49  ;;  %v875_v45 = vrot.slane %v2423_v28, %v874_v44 }
 0x22d   : > { %2067 = vmatprep.subr.mxu0 %v2292_v19 }
 0x22f   : > { %2060 = vmatmul.mubr.msk.f32.vlgmr.msra.gmra.mrb[4].mxu0 %vm638_vm3, %v2459_v53 }
 0x230   : > { %2069 = vmatprep.mubr.msk.f32.mxu0 %vm2291_vm2, %v2292_v19  ;;  %2068 = vmatpush3.msra.mxu0 %v634_v7 }
 0x231   : > { %v629_v55 = vpop.f32.mrb[2].mxu0  ;;  %2077 = vmatprep.subr.mxu0 %v2292_v19 }
 0x232   : > { %v2471_v56 = vadd.f32 %v629_v55, %v562_v54  ;;  %v2056_v57 = vpop.f32.mrb[3].mxu0 }
 0x233   : > { %v636_v57 = vld [vmem:[%s2376_s17 + $0x10] sm:$0xff] }
 0x234   : > { %2063 = vmatpush3.msra.mxu1 %v2471_v56 }
 0x235   : > { %2072 = vmatprep.subr.mxu1 %v2292_v19 }
 0x29e   : > { %v880_v5 = vpop.permute.xlu0 %879 }
 0x302   : > { %v711_v58 = vpop.f32.mrb[4].mxu0 }
 0x303   : > { %v2061_v59 = vpop.f32.mrb[5].mxu0  ;;  %v715_v60 = vsel %vm638_vm3, %v711_v58, -inf }
 0x304   : > { %716 = vmax.xlane.f32.xlu1 %v715_v60 }
 0x391   : > { %v717_v61 = vpop.xlane.xlu1 %716 }
 0x392   : > { %v718_v62 = vsub.f32 %v711_v58, %v717_v61 }
 0x394   : > { %v719_v63 = vmul.f32 1.442695, %v718_v62 }
 0x396   : > { %2232 = vpow2.f32 %v719_v63 }
 0x3a0   : > { %v2233_v0 = vpop.eup %2232 }
 0x3a1   : > { %v721_v1 = vsel %vm638_vm3, %v2233_v0, 0.0 }
 0x3a2   : > { %722 = vadd.xlane.f32.xlu1 %v721_v1 }
 0x3b3   : > { %877 = vrot.lane.b32.xlu1 %v2459_v53, %s2293_s0 }
 0x42f   : > { %v723_v2 = vpop.xlane.xlu1 %722 }
 0x430   : > { %2234 = vrcp.f32 %v723_v2 }
 0x433   : > { %v878_v6 = vpop.permute.xlu1 %877 }
 0x43a   : > { %v2235_v3 = vpop.eup %2234 }
 0x43b   : > { %v725_v4 = vmul.f32 %v2235_v3, %v2233_v0 }
 0x43d   : > { %2065 = vmatmul.mubr.msk.f32.vlgmr.msra.gmra.mrb[2].mxu1 %vm638_vm3, %v725_v4 }
 0x43e   : > { %2073 = vmatpush3.xpose.msk.msra.mxu1 %vm638_vm3, %v880_v5  ;;  %2074 = vmatprep.mubr.msk.f32.mxu1 %vm2291_vm2, %v2292_v19  ;;  %v637_v5 = vld [vmem:[%s2376_s17 + $0x18] sm:$0xff] }
 0x43f   : > { %2082 = vmatprep.subr.mxu1 %v2292_v19 }
 0x441   : > { %2075 = vmatmul.mubr.msk.f32.vlgmr.msra.gmra.mrb[4].mxu1 %vm638_vm3, %v878_v6 }
 0x442   : > { %2084 = vmatprep.mubr.msk.f32.mxu1 %vm2291_vm2, %v2292_v19  ;;  %2083 = vmatpush3.msra.mxu1 %v635_v30 }
 0x443   : > { %2092 = vmatprep.subr.mxu1 %v2292_v19 }
 0x510   : > { %v795_v8 = vpop.f32.mrb[2].mxu1 }
 0x511   : > { %v2066_v9 = vpop.f32.mrb[3].mxu1  ;;  %2070 = vmatmul.mubr.msk.f32.vlgmr.msra.gmra.mrb[6].mxu0 %vm638_vm3, %v795_v8 }
 0x512   : > { %2079 = vmatprep.mubr.msk.f32.mxu0 %vm2291_vm2, %v2292_v19 }
 0x514   : > { %v951_v10 = vpop.f32.mrb[4].mxu1 }
 0x515   : > { %v2076_v12 = vpop.f32.mrb[5].mxu1  ;;  %v955_v13 = vsel %vm638_vm3, %v951_v10, -inf }
 0x516   : > { %956 = vmax.xlane.f32.xlu1 %v955_v13 }
 0x527   : > { %1119 = vrot.lane.b32.xlu1 %v2456_v49, %s2294_s27 }
 0x52b   : > { %1117 = vrot.lane.b32.xlu1 %v2459_v53, %s2294_s27 }
 0x5a3   : > { %v957_v14 = vpop.xlane.xlu1 %956 }
 0x5a4   : > { %v958_v15 = vsub.f32 %v951_v10, %v957_v14 }
 0x5a6   : > { %v959_v16 = vmul.f32 1.442695, %v958_v15 }
 0x5a7   : > { %v1120_v25 = vpop.permute.xlu1 %1119 }
 0x5a8   : > { %2236 = vpow2.f32 %v959_v16 }
 0x5ab   : > { %v1118_v29 = vpop.permute.xlu1 %1117 }
 0x5b2   : > { %v2237_v17 = vpop.eup %2236 }
 0x5b3   : > { %v961_v18 = vsel %vm638_vm3, %v2237_v17, 0.0 }
 0x5b4   : > { %962 = vadd.xlane.f32.xlu0 %v961_v18 }
 0x5ca   : > { %967 = vrot.lane.b32.xlu0 %v2471_v56, %s2293_s0 }
 0x5e4   : > { %v868_v20 = vpop.f32.mrb[6].mxu0 }
 0x5e5   : > { %v2071_v21 = vpop.f32.mrb[7].mxu0  ;;  %v876_v46 = vadd.f32 %v875_v45, %v868_v20 }
 0x641   : > { %v963_v22 = vpop.xlane.xlu0 %962 }
 0x642   : > { %2238 = vrcp.f32 %v963_v22 }
 0x645   : > { %v968_v23 = vpop.permute.xlu0 %967 }
 0x646   : > { %2078 = vmatpush3.msra.mxu0 %v968_v23 }
 0x647   : > { %2087 = vmatprep.subr.mxu0 %v2292_v19 }
 0x64c   : > { %v2239_v24 = vpop.eup %2238 }
 0x64d   : > { %v965_v27 = vmul.f32 %v2239_v24, %v2237_v17  ;;  %v1619_v24 = vld [vmem:[%s2381_s20] sm:$0xff] }
 0x64f   : > { %2080 = vmatmul.mubr.msk.f32.vlgmr.msra.gmra.mrb[8].mxu0 %vm638_vm3, %v965_v27 }
 0x650   : > { %2088 = vmatpush3.xpose.msk.msra.mxu0 %vm638_vm3, %v1120_v25  ;;  %2089 = vmatprep.mubr.msk.f32.mxu0 %vm2291_vm2, %v2292_v19  ;;  %v1620_v25 = vld [vmem:[%s2381_s20 + $0x8] sm:$0xff] }
 0x651   : > { %2097 = vmatprep.subr.mxu0 %v2292_v19  ;;  %v2166_v27 = vpack.c.bf16 %v1620_v25, %v1619_v24 }
 0x653   : > { %2090 = vmatmul.mubr.msk.f32.vlgmr.msra.gmra.mrb[10].mxu0 %vm638_vm3, %v1118_v29  ;;  %v1622_v29 = vld [vmem:[%s2381_s20 + $0x18] sm:$0xff] }
 0x654   : > { %2099 = vmatprep.mubr.msk.f32.mxu0 %vm2291_vm2, %v2292_v19  ;;  %2098 = vmatpush3.msra.mxu0 %v636_v57 }
 0x655   : > { %2107 = vmatprep.subr.mxu0 %v2292_v19 }
 0x722   : > { %v1039_v31 = vpop.f32.mrb[8].mxu0 }
 0x723   : > { %v2081_v32 = vpop.f32.mrb[9].mxu0  ;;  %2085 = vmatmul.mubr.msk.f32.vlgmr.msra.gmra.mrb[6].mxu1 %vm638_vm3, %v1039_v31  ;;  %v1701_v31 = vld [vmem:[%s2386_s7] sm:$0xff] }
 0x724   : > { %2094 = vmatprep.mubr.msk.f32.mxu1 %vm2291_vm2, %v2292_v19  ;;  %v1702_v32 = vld [vmem:[%s2386_s7 + $0x8] sm:$0xff] }
 0x726   : > { %v1191_v33 = vpop.f32.mrb[10].mxu0 }
 0x727   : > { %v2091_v34 = vpop.f32.mrb[11].mxu0  ;;  %v1195_v35 = vsel %vm638_vm3, %v1191_v33, -inf }
 0x728   : > { %1196 = vmax.xlane.f32.xlu1 %v1195_v35  ;;  %v2172_v34 = vpack.c.bf16 %v1702_v32, %v1701_v31  ;;  %v1704_v35 = vld [vmem:[%s2386_s7 + $0x18] sm:$0xff] }
 0x739   : > { %1358 = vrot.lane.b32.xlu1 %v2456_v49, %s2295_s28 }
 0x73d   : > { %1356 = vrot.lane.b32.xlu1 %v2459_v53, %s2295_s28 }
 0x7b5   : > { %v1197_v36 = vpop.xlane.xlu1 %1196 }
 0x7b6   : > { %v1198_v37 = vsub.f32 %v1191_v33, %v1197_v36  ;;  %v1703_v33 = vld [vmem:[%s2386_s7 + $0x10] sm:$0xff] }
 0x7b7   : > { %v2175_v36 = vpack.c.bf16 %v1704_v35, %v1703_v33 }
 0x7b8   : > { %v1199_v39 = vmul.f32 1.442695, %v1198_v37  ;;  %v1705_v37 = vld [vmem:[%s2386_s7 + $0x20] sm:$0xff] }
 0x7b9   : > { %v1359_v53 = vpop.permute.xlu1 %1358 }
 0x7ba   : > { %2240 = vpow2.f32 %v1199_v39  ;;  %v1706_v39 = vld [vmem:[%s2386_s7 + $0x28] sm:$0xff] }
 0x7bd   : > { %v1357_v55 = vpop.permute.xlu1 %1356 }
 0x7c4   : > { %v2241_v40 = vpop.eup %2240 }
 0x7c5   : > { %v1201_v41 = vsel %vm638_vm3, %v2241_v40, 0.0 }
 0x7c6   : > { %1202 = vadd.xlane.f32.xlu0 %v1201_v41 }
 0x7dc   : > { %1206 = vrot.lane.b32.xlu0 %v2471_v56, %s2294_s27 }
 0x7f6   : > { %v1112_v47 = vpop.f32.mrb[6].mxu1 }
 0x7f7   : > { %v1116_v48 = vadd.f32 %v1112_v47, %v876_v46  ;;  %v2086_v49 = vpop.f32.mrb[7].mxu1  ;;  %v368_v46 = vld [vmem:[%s2396_s16 + $0x8] sm:$0xff] }
 0x7f8   : > { %v1612_v47 = vrot.slane %v368_v46, %v400_v42  ;;  %v1617_v49 = vrot.slane %v368_v46, %v482_v43  ;;  %v1711_v43 = vsub.s32 5, %v2419_v26 }
 0x853   : > { %v1203_v50 = vpop.xlane.xlu0 %1202 }
 0x854   : > { %2242 = vrcp.f32 %v1203_v50 }
 0x857   : > { %v1207_v51 = vpop.permute.xlu0 %1206 }
 0x858   : > { %2093 = vmatpush3.msra.mxu1 %v1207_v51 }
 0x859   : > { %2102 = vmatprep.subr.mxu1 %v2292_v19 }
 0x85e   : > { %v2243_v52 = vpop.eup %2242 }
 0x85f   : > { %v1205_v54 = vmul.f32 %v2243_v52, %v2241_v40  ;;  %v2178_v40 = vpack.c.bf16 %v1706_v39, %v1705_v37 }
 0x861   : > { %2095 = vmatmul.mubr.msk.f32.vlgmr.msra.gmra.mrb[8].mxu1 %vm638_vm3, %v1205_v54  ;;  %v1708_v54 = vld [vmem:[%s2386_s7 + $0x38] sm:$0xff] }
 0x862   : > { %2103 = vmatpush3.xpose.msk.msra.mxu1 %vm638_vm3, %v1359_v53  ;;  %2104 = vmatprep.mubr.msk.f32.mxu1 %vm2291_vm2, %v2292_v19  ;;  %v1707_v53 = vld [vmem:[%s2386_s7 + $0x30] sm:$0xff] }
 0x863   : > { %2112 = vmatprep.subr.mxu1 %v2292_v19 }
 0x865   : > { %2105 = vmatmul.mubr.msk.f32.vlgmr.msra.gmra.mrb[10].mxu1 %vm638_vm3, %v1357_v55  ;;  %v1625_v55 = vsub.s32 4, %v2419_v26 }
 0x866   : > { %2114 = vmatprep.mubr.msk.f32.mxu1 %vm2291_vm2, %v2292_v19  ;;  %2113 = vmatpush3.msra.mxu1 %v637_v5 }
 0x867   : > { %2171 = vmatprep.subr.bf16.mxu1 %v2290_v11  ;;  %v1626_v57 = vrot.slane %v2423_v28, %v1625_v55 }
 0x934   : > { %v1278_v58 = vpop.f32.mrb[8].mxu1 }
 0x935   : > { %v2096_v59 = vpop.f32.mrb[9].mxu1  ;;  %2100 = vmatmul.mubr.msk.f32.vlgmr.msra.gmra.mrb[12].mxu0 %vm638_vm3, %v1278_v58 }
 0x936   : > { %2109 = vmatprep.mubr.msk.f32.mxu0 %vm2291_vm2, %v2292_v19 }
 0x938   : > { %v1430_v60 = vpop.f32.mrb[10].mxu1 }
 0x939   : > { %v2106_v61 = vpop.f32.mrb[11].mxu1  ;;  %v1434_v62 = vsel %vm638_vm3, %v1430_v60, -inf }
 0x93a   : > { %1435 = vmax.xlane.f32.xlu0 %v1434_v62  ;;  %v1712_v61 = vrot.slane %v2423_v28, %v1711_v43 }
 0x950   : > { %1445 = vrot.lane.b32.xlu0 %v2471_v56, %s2295_s28 }
 0x9c7   : > { %v1436_v63 = vpop.xlane.xlu0 %1435 }
 0x9c8   : > { %v1437_v0 = vsub.f32 %v1430_v60, %v1436_v63 }
 0x9ca   : > { %v1438_v1 = vmul.f32 1.442695, %v1437_v0 }
 0x9cb   : > { %v1446_v2 = vpop.permute.xlu0 %1445 }
 0x9cc   : > { %2244 = vpow2.f32 %v1438_v1  ;;  %2108 = vmatpush3.msra.mxu0 %v1446_v2 }
 0x9cd   : > { %2165 = vmatprep.subr.bf16.mxu0 %v2290_v11 }
 0x9d6   : > { %v2245_v3 = vpop.eup %2244 }
 0x9d7   : > { %v1440_v4 = vsel %vm638_vm3, %v2245_v3, 0.0 }
 0x9d8   : > { %1441 = vadd.xlane.f32.xlu1 %v1440_v4 }
 0xa08   : > { %v1351_v6 = vpop.f32.mrb[12].mxu0 }
 0xa09   : > { %v1355_v7 = vadd.f32 %v1351_v6, %v1116_v48  ;;  %v2101_v8 = vpop.f32.mrb[13].mxu0 }
 0xa65   : > { %v1442_v56 = vpop.xlane.xlu1 %1441 }
 0xa66   : > { %2246 = vrcp.f32 %v1442_v56 }
 0xa70   : > { %v2247_v9 = vpop.eup %2246 }
 0xa71   : > { %v1444_v10 = vmul.f32 %v2247_v9, %v2245_v3 }
 0xa73   : > { %2110 = vmatmul.mubr.msk.f32.vlgmr.msra.gmra.mrb[14].mxu0 %vm638_vm3, %v1444_v10 }
 0xa74   : > { %2125 = vmatprep.mubr.msk.f32.mxu0 %vm2291_vm2, %v2292_v19  ;;  %2167 = vmatpush3.bf16.msra.mxu0 %v2166_v27 }
 0xa75   : > { %2168 = vmatprep.subr.bf16.mxu0 %v2290_v11 }
 0xb46   : > { %v1517_v12 = vpop.f32.mrb[14].mxu0 }
 0xb47   : > { %v2111_v13 = vpop.f32.mrb[15].mxu0  ;;  %2115 = vmatmul.mubr.msk.f32.vlgmr.msra.gmra.mrb[12].mxu1 %vm638_vm3, %v1517_v12 }
 0xb48   : > { %2144 = vmatprep.mubr.msk.f32.mxu1 %vm2291_vm2, %v2292_v19  ;;  %2173 = vmatpush3.bf16.msra.mxu1 %v2172_v34 }
 0xb49   : > { %2174 = vmatprep.subr.bf16.mxu1 %v2290_v11 }
 0xb4c   : > { %2176 = vmatpush3.bf16.msra.mxu1 %v2175_v36 }
 0xb4d   : > { %2177 = vmatprep.subr.bf16.mxu1 %v2290_v11 }
 0xb50   : > { %2179 = vmatpush3.bf16.msra.mxu1 %v2178_v40 }
 0xb51   : > { %2180 = vmatprep.subr.bf16.mxu1 %v2290_v11  ;;  %v2181_v11 = vpack.c.bf16 %v1708_v54, %v1707_v53 }
 0xb54   : > { %2182 = vmatpush3.bf16.msra.mxu1 %v2181_v11 }
 0xc1a   : > { %v1590_v14 = vpop.f32.mrb[12].mxu1 }
 0xc1b   : > { %v1594_v15 = vadd.f32 %v1590_v14, %v1355_v7  ;;  %v2116_v16 = vpop.f32.mrb[13].mxu1 }
 0xc1d   : > { %v1595_v17 = vadd.f32 %v1594_v15, %v2430_v38  ;;  %v1621_v38 = vld [vmem:[%s2381_s20 + $0x10] sm:$0xff] }
 0xc1e   : > { %v2169_v30 = vpack.c.bf16 %v1622_v29, %v1621_v38 }
 0xc1f   : > { %v1596_v18 = vsel %vm369_vm1, %v1595_v17, 0.0 }
 0xc20   : > { %1597 = vadd.xlane.f32.xlu1 %v1596_v18  ;;  %2170 = vmatpush3.bf16.msra.mxu0 %v2169_v30 }
 0xcad   : > { %v1598_v20 = vpop.xlane.xlu1 %1597 }
 0xcae   : > { %v1599_v21 = vmul.f32 0.03125, %v1598_v20 }
 0xcb0   : > { %v1600_v22 = vsub.f32 %v1595_v17, %v1599_v21 }
 0xcb2   : > { %v1601_v23 = vmul.f32 %v1600_v22, %v1600_v22 }
 0xcb4   : > { %v1602_v19 = vsel %vm369_vm1, %v1601_v23, 0.0 }
 0xcb5   : > { %1603 = vadd.xlane.f32.xlu1 %v1602_v19 }
 0xd42   : > { %v1604_v41 = vpop.xlane.xlu1 %1603 }
 0xd43   : > { %v1605_v44 = vmul.f32 0.03125, %v1604_v41 }
 0xd45   : > { %v1606_v45 = vadd.f32 1e-05, %v1605_v44 }
 0xd47   : > { %2248 = vrsqrt.f32 %v1606_v45 }
 0xd51   : > { %v2249_v48 = vpop.eup %2248 }
 0xd52   : > { %v1608_v50 = vmul.f32 %v2249_v48, %v1600_v22 }
 0xd54   : > { %v1613_v51 = vmul.f32 %v1612_v47, %v1608_v50 }
 0xd56   : > { %v1618_v52 = vadd.f32 %v1617_v49, %v1613_v51 }
 0xd58   : > { %2126 = vmatmul.mubr.msk.f32.vlgmr.msra.gmra.mrb[16].mxu0 %vm369_vm1, %v1618_v52 }
 0xe2b   : > { %v1696_v58 = vpop.f32.mrb[16].mxu0 }
 0xe2c   : > { %v1697_v59 = vadd.f32 %v1696_v58, %v1626_v57  ;;  %v2127_v42 = vpop.f32.mrb[17].mxu0 }
 0xe2e   : > { %v1700_v60 = vmax.f32 %v1697_v59, 0.0 }
 0xe30   : > { %2145 = vmatmul.mubr.msk.f32.vlgmr.msra.gmra.mrb[14].mxu1 %vm1713_vm4, %v1700_v60 }
 0xf02   : > { %1792 = sbr.rel (%p1964_p8) target bundleno = 3849 (0xf09), region = 52 }
 0xf03   : > { %v1783_v62 = vpop.f32.mrb[14].mxu1 }
 0xf04   : > { %v1784_v63 = vadd.f32 %v1783_v62, %v1712_v61  ;;  %v2146_v0 = vpop.f32.mrb[15].mxu1 }
 0xf06   : > { %v1787_v1 = vadd.f32 %v1784_v63, %v1618_v52 }
 0xf08   : > { %1788 = vst.msk [vmem:[#allocation2] sm:$0xff] %vm369_vm1, %v1787_v1  ;;  %1793 = vst.msk [vmem:[%s2391_s9] sm:$0xff] (!%p1964_p8), %vm369_vm1, %v1787_v1 }
 0xf09 PF: > { %s16_s25 = sadd.s32 1, %s2288_s25   ;;  %s2609_s29 = sld [smem:[#allocation3_spill]] }
 0xf0a   : > { %p13_p9 = scmp.ge.s32.totalorder %s16_s25, 6   ;;  %s2610_s21 = smov %s2280_s23 }
 0xf0b   : > { %s2611_s22 = smov %s2284_s24  ;;  %s2612_s23 = smov %s2615_s26 }
 0xf0c   :  { %15 = sbr.rel (!%p13_p9) target bundleno = 3 (0x3), region = 99 }
 0xf0f   : > { %s2613_s24 = smov %s2609_s29 }

</bundles_post_ra>
